<compile_context>
chip_gen: v6e
topology: v6e:2x2x1
jax: 0.10.0
libtpu: 0.0.40
codegen_flags: <defaults>
</compile_context>

<pallas_src>
import functools

import jax
import jax.numpy as jnp
from jax.experimental import pallas as pl
from jax.experimental.pallas import tpu as pltpu

_LANE = 128


# ---------------------------------------------------------------------------
# helpers
# ---------------------------------------------------------------------------
def _round_up(x, m):
    return ((x + m - 1) // m) * m


def _pad2d(a, rows, cols):
    r, c = a.shape
    if r == rows and c == cols:
        return a
    return jnp.pad(a, ((0, rows - r), (0, cols - c)))


def _pick_tile(n, target):
    """Largest multiple of 128 that divides n (n is a multiple of 128) and is
    <= max(target, 128)."""
    t = min(max(target, _LANE), n)
    t -= t % _LANE
    while n % t != 0:
        t -= _LANE
    return t


def _tile_targets():
    """Per-generation (tm, tk) targets for the tiled aggregation kernel."""
    try:
        kind = jax.devices()[0].device_kind.lower()
    except Exception:
        kind = ""
    if "v5" in kind:      # v5e: 128x128 MXU, lower HBM BW, small scoped VMEM
        return 128, 512
    return 256, 1024      # v6e / v7x: 256x256 MXU, ample HBM BW


# ---------------------------------------------------------------------------
# Pallas kernel 1 (large-graph path): K-tiled  relu(A_hat @ Y + b)
# ---------------------------------------------------------------------------
def _gcn_aggregate_kernel(a_ref, y_ref, b_ref, o_ref, acc_ref):
    # a_ref: (tm, tk) bf16 tile of A_hat     y_ref: (tk, Hp) bf16 K-slab of Y
    # b_ref: (1, Hp)  f32 bias               o_ref: (tm, Hp) output tile
    # acc_ref: (tm, Hp) f32 accumulator (resident across the K axis)
    k = pl.program_id(1)

    @pl.when(k == 0)
    def _():
        acc_ref[...] = jnp.zeros_like(acc_ref)

    acc_ref[...] += jnp.dot(a_ref[...], y_ref[...],
                            preferred_element_type=jnp.float32)

    @pl.when(k == pl.num_programs(1) - 1)
    def _():
        o_ref[...] = jnp.maximum(acc_ref[...] + b_ref[...], 0.0).astype(o_ref.dtype)


def _gcn_aggregate(a_bf16, y_bf16, b_f32, *, out_dtype, tm_target, tk_target):
    n = a_bf16.shape[0]
    hp = y_bf16.shape[1]
    tm = _pick_tile(n, tm_target)
    tk = _pick_tile(n, tk_target)

    out_isz = 4 if out_dtype == jnp.float32 else 2
    est = (2 * tm * tk * 2          # A_hat tile, bf16, double buffered
           + 2 * tk * hp * 2        # Y K-slab, bf16, double buffered
           + 2 * hp * 4             # bias
           + 2 * tm * hp * out_isz  # output tile, double buffered
           + tm * hp * 4)           # f32 accumulator scratch
    vmem_limit = int(min(max(2 * est, 32 * 1024 * 1024), 48 * 1024 * 1024))

    return pl.pallas_call(
        _gcn_aggregate_kernel,
        out_shape=jax.ShapeDtypeStruct((n, hp), out_dtype),
        grid_spec=pltpu.PrefetchScalarGridSpec(
            num_scalar_prefetch=0,
            grid=(n // tm, n // tk),                           # K axis last
            in_specs=[
                pl.BlockSpec((tm, tk), lambda i, k: (i, k)),   # A_hat tile
                pl.BlockSpec((tk, hp), lambda i, k: (k, 0)),   # Y K-slab
                pl.BlockSpec((1, hp), lambda i, k: (0, 0)),    # bias
            ],
            out_specs=pl.BlockSpec((tm, hp), lambda i, k: (i, 0)),
            scratch_shapes=[pltpu.VMEM((tm, hp), jnp.float32)],
        ),
        compiler_params=pltpu.CompilerParams(
            dimension_semantics=("parallel", "arbitrary"),
            vmem_limit_bytes=vmem_limit,
        ),
    )(a_bf16, y_bf16, b_f32)


# ---------------------------------------------------------------------------
# Pallas kernel 2 (small-graph path): whole forward fused, VMEM resident
# ---------------------------------------------------------------------------
def _fused_gnn_kernel(a_ref, x_ref, w_ref, b_ref, o_ref):
    # a_ref: (Np, Np) bf16   x_ref: (Np, Cp) bf16
    # w_ref: (L, Cp, Cp) bf16   b_ref: (L, 1, Cp) f32   o_ref: (Np, Hp) f32
    num_layers = w_ref.shape[0]
    a = a_ref[...]
    h = x_ref[...]
    for layer in range(num_layers):        # static unroll, num_layers is small
        y = jnp.dot(h, w_ref[layer], preferred_element_type=jnp.float32)
        z = jnp.dot(a, y.astype(jnp.bfloat16),
                    preferred_element_type=jnp.float32) + b_ref[layer]
        h = jnp.maximum(z, 0.0).astype(jnp.bfloat16)
    o_ref[...] = h[:, :o_ref.shape[1]].astype(o_ref.dtype)


def _fused_vmem_estimate(n_pad, c_max, h_pad, num_layers):
    return (2 * 2 * (n_pad * n_pad + n_pad * c_max + num_layers * c_max * c_max)
            + 2 * 4 * num_layers * c_max
            + 2 * 4 * n_pad * h_pad
            + 4 * 4 * n_pad * c_max)       # slack for in-kernel f32 temporaries


def _fused_forward(a_p, x, weights, biases, n_pad, c_max, h_pad):
    num_layers = len(weights)
    x_p = _pad2d(x.astype(jnp.float32), n_pad, c_max).astype(jnp.bfloat16)
    w_stack = jnp.stack(
        [_pad2d(w.astype(jnp.float32), c_max, c_max) for w in weights]
    ).astype(jnp.bfloat16)
    b_stack = jnp.stack(
        [_pad2d(b.reshape(1, -1).astype(jnp.float32), 1, c_max) for b in biases]
    )
    est = _fused_vmem_estimate(n_pad, c_max, h_pad, num_layers)
    vmem_limit = int(min(max(est + (8 << 20), 32 << 20), 48 << 20))

    return pl.pallas_call(
        _fused_gnn_kernel,
        out_shape=jax.ShapeDtypeStruct((n_pad, h_pad), jnp.float32),
        grid_spec=pltpu.PrefetchScalarGridSpec(
            num_scalar_prefetch=0,
            grid=(1,),
            in_specs=[
                pl.BlockSpec((n_pad, n_pad), lambda i: (0, 0)),
                pl.BlockSpec((n_pad, c_max), lambda i: (0, 0)),
                pl.BlockSpec((num_layers, c_max, c_max), lambda i: (0, 0, 0)),
                pl.BlockSpec((num_layers, 1, c_max), lambda i: (0, 0, 0)),
            ],
            out_specs=pl.BlockSpec((n_pad, h_pad), lambda i: (0, 0)),
        ),
        compiler_params=pltpu.CompilerParams(
            dimension_semantics=("arbitrary",),
            vmem_limit_bytes=vmem_limit,
        ),
    )(a_p, x_p, w_stack, b_stack)


# ---------------------------------------------------------------------------
# forward pass (jk='last', norm=None, dropout=0.0, act=ReLU)
# ---------------------------------------------------------------------------
def _tiled_forward(a_p, x, weights, biases, n_pad):
    tm_target, tk_target = _tile_targets()
    num_layers = len(weights)
    h_cur = _pad2d(x.astype(jnp.float32), n_pad, x.shape[1])   # row pad only
    for li, (w, b) in enumerate(zip(weights, biases)):
        hp = _round_up(w.shape[1], _LANE)
        wp = _pad2d(w.astype(jnp.float32), h_cur.shape[1], hp)
        bp = _pad2d(b.reshape(1, -1).astype(jnp.float32), 1, hp)
        # Hoisted feature transform: tiny [N, C] x [C, H] matmul in plain XLA
        # (K=C is far below MXU depth); the Pallas kernel then runs a single
        # K=N matmul per layer.
        y = jnp.dot(h_cur.astype(jnp.float32), wp,
                    preferred_element_type=jnp.float32).astype(jnp.bfloat16)
        out_dtype = jnp.float32 if li == num_layers - 1 else jnp.bfloat16
        h_cur = _gcn_aggregate(a_p, y, bp, out_dtype=out_dtype,
                               tm_target=tm_target, tk_target=tk_target)
    return h_cur


def gnn_forward(x, a_hat, weights, biases, mode="auto"):
    """x_{l+1} = relu(A_hat @ x_l @ W_l + b_l), return last layer (jk='last')."""
    n, c_in = x.shape
    h_out = weights[-1].shape[1]
    num_layers = len(weights)

    n_pad = _round_up(n, _LANE)
    c_pad = _round_up(c_in, _LANE)
    h_pad = _round_up(h_out, _LANE)
    c_max = max(c_pad, h_pad)

    # A_hat streamed as bf16 (halves the dominant N^2 HBM traffic, MXU bf16
    # path). Zero padding is exact: padded columns of A are zero, so padded
    # nodes never contaminate real rows.
    a_p = _pad2d(a_hat.astype(jnp.float32), n_pad, n_pad).astype(jnp.bfloat16)

    if mode == "auto":
        mode = ("fused"
                if _fused_vmem_estimate(n_pad, c_max, h_pad, num_layers)
                <= 24 * 1024 * 1024 else "tiled")

    if mode == "fused":
        out_p = _fused_forward(a_p, x, weights, biases, n_pad, c_max, h_pad)
    else:
        out_p = _tiled_forward(a_p, x, weights, biases, n_pad)
    return out_p[:n, :h_out]


_gnn_forward_jit = jax.jit(gnn_forward, static_argnames=("mode",))


# ---------------------------------------------------------------------------
# Glue: dense symmetric-normalized adjacency from edge_index (plain JAX)
# ---------------------------------------------------------------------------
def build_normalized_adjacency(edge_index, num_nodes, dtype=jnp.float32):
    """A_hat = D^-1/2 (A + I_remaining) D^-1/2 from a [2, E] edge_index."""
    src, dst = edge_index[0], edge_index[1]
    adj = jnp.zeros((num_nodes, num_nodes), dtype=dtype)
    # GCN aggregates j -> i over edges (j, i); duplicates scatter-add (PyG).
    adj = adj.at[dst, src].add(1.0)
    # add_remaining_self_loops: only add a self-loop where none is present.
    idx = jnp.arange(num_nodes)
    diag = adj[idx, idx]
    adj = adj.at[idx, idx].set(jnp.where(diag > 0, diag, 1.0))
    deg = jnp.sum(adj, axis=1)
    d_inv_sqrt = jnp.where(deg > 0, 1.0 / jnp.sqrt(deg), 0.0)
    return adj * d_inv_sqrt[:, None] * d_inv_sqrt[None, :]
    # TODO(synk): real graphs are sparse; block-sparse A_hat skipping via
    # PrefetchScalarGridSpec (per-row-tile nonzero column-block lists) is the
    # long-term path instead of a dense N x N adjacency.


# ---------------------------------------------------------------------------
# BasicGNN (GCN variant), jk='last', norm=None, dropout=0.0, act=ReLU
# ---------------------------------------------------------------------------
class BasicGNNPallas:
    def __init__(self, in_channels, hidden_channels, num_layers, key):
        self.in_channels = in_channels
        self.hidden_channels = hidden_channels
        self.out_channels = hidden_channels
        self.num_layers = num_layers
        self.weights = []
        self.biases = []
        c_in = in_channels
        for _ in range(num_layers):
            key, wk = jax.random.split(key)
            limit = float(jnp.sqrt(6.0 / (c_in + hidden_channels)))
            w = jax.random.uniform(wk, (c_in, hidden_channels), jnp.float32,
                                   -limit, limit)
            b = jnp.zeros((1, hidden_channels), jnp.float32)
            self.weights.append(w)
            self.biases.append(b)
            c_in = hidden_channels
        # TODO(synk): jk='cat'/'max' (JumpingKnowledge) and norm layers are not
        # implemented; default jk='last' returns the last layer's output.

    def __call__(self, x, a_hat, mode="auto"):
        return _gnn_forward_jit(x, a_hat, tuple(self.weights),
                                tuple(self.biases), mode=mode)


# ---------------------------------------------------------------------------
# Pure-JAX f32 reference for correctness checking
# ---------------------------------------------------------------------------
def reference_forward(x, a_hat, weights, biases):
    h = x
    for w, b in zip(weights, biases):
        h = jnp.maximum(a_hat @ h @ w + b, 0.0)
    return h


if __name__ == "__main__":
    key = jax.random.PRNGKey(0)
    num_nodes = 128
    in_channels = 32
    hidden_channels = 32
    num_layers = 2
    num_edges = 512

    key, kx, ke, kp = jax.random.split(key, 4)
    x = jax.random.normal(kx, (num_nodes, in_channels), jnp.float32)
    edge_index = jax.random.randint(ke, (2, num_edges), 0, num_nodes, jnp.int32)

    a_hat = build_normalized_adjacency(edge_index, num_nodes)

    model = BasicGNNPallas(in_channels, hidden_channels, num_layers, kp)
    ref = reference_forward(x, a_hat, model.weights, model.biases)

    # Small-graph fused path (single pallas_call, VMEM resident across layers).
    out_fused = jax.block_until_ready(model(x, a_hat, mode="fused"))
    # Large-graph path (per-layer K-tiled aggregation kernel) on the same data.
    out_tiled = jax.block_until_ready(model(x, a_hat, mode="tiled"))
    # Auto path selection (picks fused at this size).
    out_auto = jax.block_until_ready(model(x, a_hat))

    assert out_fused.shape == (num_nodes, hidden_channels)
    assert out_tiled.shape == (num_nodes, hidden_channels)
    # bf16 operands with f32 accumulation -> loosened tolerances vs f32 ref.
    assert jnp.allclose(out_fused, ref, atol=5e-2, rtol=5e-2)
    assert jnp.allclose(out_tiled, ref, atol=5e-2, rtol=5e-2)
    assert jnp.allclose(out_auto, ref, atol=5e-2, rtol=5e-2)

    print("KERNEL_OK")
</pallas_src>

<mosaic_0001>
module attributes {stable_mosaic.version = 11 : i64} {
  func.func @_fused_gnn_kernel(%arg0: i32, %arg1: memref<128x128xbf16, #tpu.memory_space<vmem>>, %arg2: memref<128x128xbf16, #tpu.memory_space<vmem>>, %arg3: memref<2x128x128xbf16, #tpu.memory_space<vmem>>, %arg4: memref<2x1x128xf32, #tpu.memory_space<vmem>>, %arg5: memref<128x128xf32, #tpu.memory_space<vmem>>) attributes {dimension_semantics = [#tpu.dimension_semantics<arbitrary>], iteration_bounds = array<i64: 1>, scalar_prefetch = 0 : i64, scratch_operands = 0 : i64, tpu.core_type = #tpu.core_type<tc>, window_params = [{pipeline_mode = #tpu.pipeline_mode<synchronous>, transform_indices = @transform_0, window_bounds = array<i64: 128, 128>}, {pipeline_mode = #tpu.pipeline_mode<synchronous>, transform_indices = @transform_1, window_bounds = array<i64: 128, 128>}, {pipeline_mode = #tpu.pipeline_mode<synchronous>, transform_indices = @transform_2, window_bounds = array<i64: 2, 128, 128>}, {pipeline_mode = #tpu.pipeline_mode<synchronous>, transform_indices = @transform_3, window_bounds = array<i64: 2, 1, 128>}, {pipeline_mode = #tpu.pipeline_mode<synchronous>, transform_indices = @transform_4, window_bounds = array<i64: 128, 128>}]} {
    %c0 = arith.constant 0 : index
    %c0_0 = arith.constant 0 : index
    %0 = vector.load %arg1[%c0, %c0_0] : memref<128x128xbf16, #tpu.memory_space<vmem>>, vector<128x128xbf16>
    %c0_1 = arith.constant 0 : index
    %c0_2 = arith.constant 0 : index
    %1 = vector.load %arg2[%c0_1, %c0_2] : memref<128x128xbf16, #tpu.memory_space<vmem>>, vector<128x128xbf16>
    %c0_3 = arith.constant 0 : index
    %c0_4 = arith.constant 0 : index
    %c0_5 = arith.constant 0 : index
    %2 = vector.load %arg3[%c0_3, %c0_4, %c0_5] : memref<2x128x128xbf16, #tpu.memory_space<vmem>>, vector<1x128x128xbf16>
    %3 = vector.shape_cast %2 : vector<1x128x128xbf16> to vector<128x128xbf16>
    %cst = arith.constant dense<0.000000e+00> : vector<128x128xf32>
    %4 = tpu.matmul %1, %3, %cst {dimension_numbers = #tpu.dot_dimension_numbers<[1], [0], [0], [1], [0, 0, 1, 1], [], []>} : vector<128x128xbf16>, vector<128x128xbf16>, vector<128x128xf32> -> vector<128x128xf32>
    %5 = arith.truncf %4 : vector<128x128xf32> to vector<128x128xbf16>
    %cst_6 = arith.constant dense<0.000000e+00> : vector<128x128xf32>
    %6 = tpu.matmul %0, %5, %cst_6 {dimension_numbers = #tpu.dot_dimension_numbers<[1], [0], [0], [1], [0, 0, 1, 1], [], []>} : vector<128x128xbf16>, vector<128x128xbf16>, vector<128x128xf32> -> vector<128x128xf32>
    %c0_7 = arith.constant 0 : index
    %c0_8 = arith.constant 0 : index
    %c0_9 = arith.constant 0 : index
    %7 = vector.load %arg4[%c0_7, %c0_8, %c0_9] : memref<2x1x128xf32, #tpu.memory_space<vmem>>, vector<1x1x128xf32>
    %8 = vector.shape_cast %7 : vector<1x1x128xf32> to vector<1x128xf32>
    %9 = vector.broadcast %8 : vector<1x128xf32> to vector<128x128xf32>
    %10 = arith.addf %6, %9 : vector<128x128xf32>
    %cst_10 = arith.constant 0.000000e+00 : f32
    %11 = vector.broadcast %cst_10 : f32 to vector<128x128xf32>
    %12 = arith.maximumf %10, %11 : vector<128x128xf32>
    %13 = arith.truncf %12 : vector<128x128xf32> to vector<128x128xbf16>
    %c1 = arith.constant 1 : index
    %c0_11 = arith.constant 0 : index
    %c0_12 = arith.constant 0 : index
    %14 = vector.load %arg3[%c1, %c0_11, %c0_12] : memref<2x128x128xbf16, #tpu.memory_space<vmem>>, vector<1x128x128xbf16>
    %15 = vector.shape_cast %14 : vector<1x128x128xbf16> to vector<128x128xbf16>
    %cst_13 = arith.constant dense<0.000000e+00> : vector<128x128xf32>
    %16 = tpu.matmul %13, %15, %cst_13 {dimension_numbers = #tpu.dot_dimension_numbers<[1], [0], [0], [1], [0, 0, 1, 1], [], []>} : vector<128x128xbf16>, vector<128x128xbf16>, vector<128x128xf32> -> vector<128x128xf32>
    %17 = arith.truncf %16 : vector<128x128xf32> to vector<128x128xbf16>
    %cst_14 = arith.constant dense<0.000000e+00> : vector<128x128xf32>
    %18 = tpu.matmul %0, %17, %cst_14 {dimension_numbers = #tpu.dot_dimension_numbers<[1], [0], [0], [1], [0, 0, 1, 1], [], []>} : vector<128x128xbf16>, vector<128x128xbf16>, vector<128x128xf32> -> vector<128x128xf32>
    %c1_15 = arith.constant 1 : index
    %c0_16 = arith.constant 0 : index
    %c0_17 = arith.constant 0 : index
    %19 = vector.load %arg4[%c1_15, %c0_16, %c0_17] : memref<2x1x128xf32, #tpu.memory_space<vmem>>, vector<1x1x128xf32>
    %20 = vector.shape_cast %19 : vector<1x1x128xf32> to vector<1x128xf32>
    %21 = vector.broadcast %20 : vector<1x128xf32> to vector<128x128xf32>
    %22 = arith.addf %18, %21 : vector<128x128xf32>
    %cst_18 = arith.constant 0.000000e+00 : f32
    %23 = vector.broadcast %cst_18 : f32 to vector<128x128xf32>
    %24 = arith.maximumf %22, %23 : vector<128x128xf32>
    %25 = arith.truncf %24 : vector<128x128xf32> to vector<128x128xbf16>
    %26 = arith.extf %25 : vector<128x128xbf16> to vector<128x128xf32>
    %c0_19 = arith.constant 0 : index
    %c0_20 = arith.constant 0 : index
    %27 = vector.load %arg5[%c0_19, %c0_20] : memref<128x128xf32, #tpu.memory_space<vmem>>, vector<128x128xf32>
    tpu.vector_store %arg5[%c0_19, %c0_20], %26 {strides = array<i32>} : memref<128x128xf32, #tpu.memory_space<vmem>>, vector<128x128xf32>,
    return
  }
  func.func @transform_0(%arg0: i32) -> (i32, i32) {
    %c0_i32 = arith.constant 0 : i32
    %c0_i32_0 = arith.constant 0 : i32
    %c0_i32_1 = arith.constant 0 : i32
    return %c0_i32, %c0_i32_0 : i32, i32
  }
  func.func @transform_1(%arg0: i32) -> (i32, i32) {
    %c0_i32 = arith.constant 0 : i32
    %c0_i32_0 = arith.constant 0 : i32
    %c0_i32_1 = arith.constant 0 : i32
    return %c0_i32, %c0_i32_0 : i32, i32
  }
  func.func @transform_2(%arg0: i32) -> (i32, i32, i32) {
    %c0_i32 = arith.constant 0 : i32
    %c0_i32_0 = arith.constant 0 : i32
    %c0_i32_1 = arith.constant 0 : i32
    %c0_i32_2 = arith.constant 0 : i32
    return %c0_i32, %c0_i32_0, %c0_i32_1 : i32, i32, i32
  }
  func.func @transform_3(%arg0: i32) -> (i32, i32, i32) {
    %c0_i32 = arith.constant 0 : i32
    %c0_i32_0 = arith.constant 0 : i32
    %c0_i32_1 = arith.constant 0 : i32
    %c0_i32_2 = arith.constant 0 : i32
    return %c0_i32, %c0_i32_0, %c0_i32_1 : i32, i32, i32
  }
  func.func @transform_4(%arg0: i32) -> (i32, i32) {
    %c0_i32 = arith.constant 0 : i32
    %c0_i32_0 = arith.constant 0 : i32
    %c0_i32_1 = arith.constant 0 : i32
    return %c0_i32, %c0_i32_0 : i32, i32
  }
}

</mosaic_0001>

<bundles_post_ra>
// kernel: gnn_forward.1
= control target key start
LH: loop header
LB: loop body
LE: loop exit
PB: predicated region body
PF: predicated region fallthrough
CT: control target
= control target key end

     0   :  { %s1278_s2 = inlined_call_operand.vmem [shape: bf16[2,128,128], index: 2, kind: input, shape index: {}]   ;;  %s1279_s1 = inlined_call_operand.vmem [shape: bf16[128,128], index: 1, kind: input, shape index: {}]   ;;  %s1280_s0 = inlined_call_operand.vmem [shape: bf16[128,128], index: 0, kind: input, shape index: {}]   ;;  %s1281_s3 = inlined_call_operand.vmem [shape: f32[2,1,128], index: 3, kind: input, shape index: {}]   ;;  %s1282_s4 = inlined_call_operand.vmem [shape: f32[128,128], index: 4, kind: output, shape index: {}]  }
   0x1   :  { %v1021_v0 = vld [vmem:[%s1278_s2 + $0x38] sm:$0xff]   ;;  %v1022_v1 = vld [vmem:[%s1278_s2 + $0x30] sm:$0xff]   ;;  %v1023_v2 = vld [vmem:[%s1278_s2 + $0x28] sm:$0xff]  }
   0x2   :  { %893 = vmatprep.subr.bf16.mxu0 %v1021_v0  ;;  %v1024_v3 = vld [vmem:[%s1278_s2 + $0x20] sm:$0xff]   ;;  %v1025_v5 = vld [vmem:[%s1278_s2 + $0x18] sm:$0xff]   ;;  %v1026_v6 = vld [vmem:[%s1278_s2 + $0x10] sm:$0xff]  }
   0x3   :  { %894 = vmatpush3.bf16.msra.mxu0 %v1021_v0  ;;  %v1029_v4 = vld [vmem:[%s1279_s1] sm:$0xff]   ;;  %v1027_v7 = vld [vmem:[%s1278_s2 + $0x8] sm:$0xff]   ;;  %v1031_v10 = vld [vmem:[%s1279_s1 + $0x10] sm:$0xff]  }
   0x4   :  { %895 = vmatprep.subr.bf16.mxu0 %v1022_v1  ;;  %909 = vmatprep.mubr.bf16.mxu0 %v1029_v4  ;;  %v1028_v8 = vld [vmem:[%s1278_s2] sm:$0xff]   ;;  %v1030_v9 = vld [vmem:[%s1279_s1 + $0x8] sm:$0xff]   ;;  %v1032_v11 = vld [vmem:[%s1279_s1 + $0x18] sm:$0xff]  }
   0x5   :  { %v1033_v12 = vld [vmem:[%s1279_s1 + $0x20] sm:$0xff]   ;;  %v1034_v13 = vld [vmem:[%s1279_s1 + $0x28] sm:$0xff]   ;;  %v1035_v14 = vld [vmem:[%s1279_s1 + $0x30] sm:$0xff]  }
   0x6   :  { %v1036_v15 = vld [vmem:[%s1279_s1 + $0x38] sm:$0xff]   ;;  %v1129_v16 = vld [vmem:[%s1280_s0] sm:$0xff]   ;;  %v1046_v18 = vld [vmem:[%s1278_s2 + $0x70] sm:$0xff]  }
   0x7   :  { %896 = vmatpush3.bf16.msra.mxu0 %v1022_v1  ;;  %941 = vmatprep.mubr.bf16.mxu1 %v1129_v16  ;;  %v1045_v17 = vld [vmem:[%s1278_s2 + $0x78] sm:$0xff]   ;;  %v1047_v19 = vld [vmem:[%s1278_s2 + $0x68] sm:$0xff]   ;;  %v1048_v20 = vld [vmem:[%s1278_s2 + $0x60] sm:$0xff]  }
   0x8   :  { %897 = vmatprep.subr.bf16.mxu0 %v1023_v2  ;;  %v1049_v21 = vld [vmem:[%s1278_s2 + $0x58] sm:$0xff]   ;;  %v1150_v46 = vld [vmem:[%s1280_s0 + $0x8] sm:$0xff]   ;;  %v1155_v47 = vld [vmem:[%s1280_s0 + $0x10] sm:$0xff]  }
   0x9   :  { %v1162_v48 = vld [vmem:[%s1280_s0 + $0x18] sm:$0xff]   ;;  %v1167_v49 = vld [vmem:[%s1280_s0 + $0x20] sm:$0xff]   ;;  %v1174_v50 = vld [vmem:[%s1280_s0 + $0x28] sm:$0xff]  }
   0xa   :  { %v1179_v51 = vld [vmem:[%s1280_s0 + $0x30] sm:$0xff]   ;;  %v1186_v52 = vld [vmem:[%s1280_s0 + $0x38] sm:$0xff]   ;;  %v1051_v54 = vld [vmem:[%s1278_s2 + $0x48] sm:$0xff]  }
   0xb   :  { %898 = vmatpush3.bf16.msra.mxu0 %v1023_v2  ;;  %v1050_v53 = vld [vmem:[%s1278_s2 + $0x50] sm:$0xff]   ;;  %v1052_v55 = vld [vmem:[%s1278_s2 + $0x40] sm:$0xff]  }
   0xc   :  { %899 = vmatprep.subr.bf16.mxu0 %v1024_v3  ;;  %v794_v58 = vld [vmem:[%s1281_s3] ss:$0 sm:$0xff] }
   0xf   :  { %900 = vmatpush3.bf16.msra.mxu0 %v1024_v3 }
  0x10   :  { %901 = vmatprep.subr.bf16.mxu0 %v1025_v5 }
  0x13   :  { %902 = vmatpush3.bf16.msra.mxu0 %v1025_v5 }
  0x14   :  { %903 = vmatprep.subr.bf16.mxu0 %v1026_v6 }
  0x17   :  { %904 = vmatpush3.bf16.msra.mxu0 %v1026_v6 }
  0x18   :  { %905 = vmatprep.subr.bf16.mxu0 %v1027_v7 }
  0x1b   :  { %906 = vmatpush3.bf16.msra.mxu0 %v1027_v7 }
  0x1c   :  { %907 = vmatprep.subr.bf16.mxu0 %v1028_v8 }
  0x1f   :  { %908 = vmatpush3.bf16.msra.mxu0 %v1028_v8 }
  0x20   :  { %957 = vmatprep.subr.bf16.mxu0 %v1045_v17 }
  0x22   :  { %910 = vmatmul.mubr.bf16.vlgmr.msra.gmra.mxu0 %v1030_v9 }
  0x23   :  { %913 = vmatprep.mubr.bf16.mxu0 %v1031_v10  ;;  %958 = vmatpush3.bf16.msra.mxu0 %v1045_v17 }
  0x24   :  { %959 = vmatprep.subr.bf16.mxu0 %v1046_v18 }
  0x27   :  { %960 = vmatpush3.bf16.msra.mxu0 %v1046_v18 }
  0x28   :  { %961 = vmatprep.subr.bf16.mxu0 %v1047_v19 }
  0x2a   :  { %914 = vmatmul.mubr.bf16.gmra.mxu0 %v1032_v11 }
  0x2b   :  { %917 = vmatprep.mubr.bf16.mxu0 %v1033_v12  ;;  %962 = vmatpush3.bf16.msra.mxu0 %v1047_v19 }
  0x2c   :  { %963 = vmatprep.subr.bf16.mxu0 %v1048_v20 }
  0x2f   :  { %964 = vmatpush3.bf16.msra.mxu0 %v1048_v20 }
  0x30   :  { %965 = vmatprep.subr.bf16.mxu0 %v1049_v21 }
  0x32   :  { %918 = vmatmul.mubr.bf16.gmra.mxu0 %v1034_v13 }
  0x33   :  { %921 = vmatprep.mubr.bf16.mxu0 %v1035_v14  ;;  %966 = vmatpush3.bf16.msra.mxu0 %v1049_v21 }
  0x34   :  { %967 = vmatprep.subr.bf16.mxu0 %v1050_v53 }
  0x37   :  { %968 = vmatpush3.bf16.msra.mxu0 %v1050_v53 }
  0x38   :  { %969 = vmatprep.subr.bf16.mxu0 %v1051_v54 }
  0x3a   :  { %922 = vmatmul.mubr.bf16.gmra.mxu0 %v1036_v15 }
  0x3b   :  { %970 = vmatpush3.bf16.msra.mxu0 %v1051_v54 }
  0x3c   :  { %971 = vmatprep.subr.bf16.mxu0 %v1052_v55 }
  0x3f   :  { %972 = vmatpush3.bf16.msra.mxu0 %v1052_v55 }
  0xe2   :  { %v911_v22 = vpop.f32.mrf.mxu0 }
  0xe4   :  { %v196_v23 = vpop.f32.mrf.mxu0 }
  0xe6   :  { %v912_v24 = vpop.f32.mrf.mxu0 }
  0xe7   :  { %v260_v44 = vpack.c.bf16 %v912_v24, %v911_v22 }
  0xe8   :  { %v199_v25 = vpop.f32.mrf.mxu0 }
  0xe9   :  { %v259_v45 = vpack.c.bf16 %v199_v25, %v196_v23 }
  0xea   :  { %v915_v26 = vpop.f32.mrf.mxu0 }
  0xec   :  { %v212_v27 = vpop.f32.mrf.mxu0 }
  0xee   :  { %v916_v28 = vpop.f32.mrf.mxu0 }
  0xef   :  { %v262_v42 = vpack.c.bf16 %v916_v28, %v915_v26 }
  0xf0   :  { %v215_v29 = vpop.f32.mrf.mxu0 }
  0xf1   :  { %v261_v43 = vpack.c.bf16 %v215_v29, %v212_v27 }
  0xf2   :  { %v919_v30 = vpop.f32.mrf.mxu0 }
  0xf4   :  { %v228_v31 = vpop.f32.mrf.mxu0 }
  0xf6   :  { %v920_v32 = vpop.f32.mrf.mxu0 }
  0xf7   :  { %v264_v40 = vpack.c.bf16 %v920_v32, %v919_v30 }
  0xf8   :  { %v231_v33 = vpop.f32.mrf.mxu0 }
  0xf9   :  { %v263_v41 = vpack.c.bf16 %v231_v33, %v228_v31 }
  0xfa   :  { %v923_v34 = vpop.f32.mrf.mxu0 }
  0xfc   :  { %v244_v35 = vpop.f32.mrf.mxu0 }
  0xfe   :  { %v924_v36 = vpop.f32.mrf.mxu0 }
  0xff   :  { %v266_v37 = vpack.c.bf16 %v924_v36, %v923_v34 }
 0x100   :  { %v247_v38 = vpop.f32.mrf.mxu0 }
 0x101   :  { %v265_v39 = vpack.c.bf16 %v247_v38, %v244_v35  ;;  %925 = vmatprep.subr.bf16.mxu1 %v266_v37 }
 0x102   :  { %926 = vmatpush3.bf16.msra.mxu1 %v266_v37 }
 0x103   :  { %927 = vmatprep.subr.bf16.mxu1 %v265_v39 }
 0x106   :  { %928 = vmatpush3.bf16.msra.mxu1 %v265_v39 }
 0x107   :  { %929 = vmatprep.subr.bf16.mxu1 %v264_v40 }
 0x10a   :  { %930 = vmatpush3.bf16.msra.mxu1 %v264_v40 }
 0x10b   :  { %931 = vmatprep.subr.bf16.mxu1 %v263_v41 }
 0x10e   :  { %932 = vmatpush3.bf16.msra.mxu1 %v263_v41 }
 0x10f   :  { %933 = vmatprep.subr.bf16.mxu1 %v262_v42 }
 0x112   :  { %934 = vmatpush3.bf16.msra.mxu1 %v262_v42 }
 0x113   :  { %935 = vmatprep.subr.bf16.mxu1 %v261_v43 }
 0x116   :  { %936 = vmatpush3.bf16.msra.mxu1 %v261_v43 }
 0x117   :  { %937 = vmatprep.subr.bf16.mxu1 %v260_v44 }
 0x11a   :  { %938 = vmatpush3.bf16.msra.mxu1 %v260_v44 }
 0x11b   :  { %939 = vmatprep.subr.bf16.mxu1 %v259_v45 }
 0x11e   :  { %940 = vmatpush3.bf16.msra.mxu1 %v259_v45 }
 0x121   :  { %942 = vmatmul.mubr.bf16.vlgmr.msra.gmra.mxu1 %v1150_v46 }
 0x122   :  { %945 = vmatprep.mubr.bf16.mxu1 %v1155_v47 }
 0x129   :  { %946 = vmatmul.mubr.bf16.gmra.mxu1 %v1162_v48 }
 0x12a   :  { %949 = vmatprep.mubr.bf16.mxu1 %v1167_v49 }
 0x131   :  { %950 = vmatmul.mubr.bf16.gmra.mxu1 %v1174_v50 }
 0x132   :  { %953 = vmatprep.mubr.bf16.mxu1 %v1179_v51 }
 0x139   :  { %954 = vmatmul.mubr.bf16.gmra.mxu1 %v1186_v52 }
 0x13a   :  { %1005 = vmatprep.mubr.bf16.mxu1 %v1129_v16 }
 0x1e1   :  { %v943_v56 = vpop.f32.mrf.mxu1 }
 0x1e2   :  { %v365_v62 = vadd.f32 %v943_v56, %v794_v58 }
 0x1e3   :  { %v356_v57 = vpop.f32.mrf.mxu1 }
 0x1e4   :  { %v357_v60 = vadd.f32 %v794_v58, %v356_v57  ;;  %v421_v5 = vmax.f32 %v365_v62, 0.0 }
 0x1e5   :  { %v944_v59 = vpop.f32.mrf.mxu1 }
 0x1e6   :  { %v368_v61 = vadd.f32 %v944_v59, %v794_v58  ;;  %v419_v3 = vmax.f32 %v357_v60, 0.0 }
 0x1e7   :  { %v359_v63 = vpop.f32.mrf.mxu1 }
 0x1e8   :  { %v360_v0 = vadd.f32 %v794_v58, %v359_v63  ;;  %v422_v1 = vmax.f32 %v368_v61, 0.0 }
 0x1e9   :  { %v947_v2 = vpop.f32.mrf.mxu1 }
 0x1ea   :  { %v420_v4 = vmax.f32 %v360_v0, 0.0  ;;  %v436_v8 = vpack.c.bf16 %v422_v1, %v421_v5  ;;  %v381_v12 = vadd.f32 %v947_v2, %v794_v58 }
 0x1eb   :  { %v372_v6 = vpop.f32.mrf.mxu1 }
 0x1ec   :  { %v435_v7 = vpack.c.bf16 %v420_v4, %v419_v3  ;;  %v373_v10 = vadd.f32 %v794_v58, %v372_v6  ;;  %v425_v19 = vmax.f32 %v381_v12, 0.0 }
 0x1ed   :  { %v948_v9 = vpop.f32.mrf.mxu1 }
 0x1ee   :  { %v384_v11 = vadd.f32 %v948_v9, %v794_v58  ;;  %973 = vmatprep.mubr.bf16.mxu0 %v435_v7  ;;  %v423_v17 = vmax.f32 %v373_v10, 0.0 }
 0x1ef   :  { %v375_v13 = vpop.f32.mrf.mxu1  ;;  %974 = vmatmul.mubr.bf16.vlgmr.msra.gmra.mxu0 %v436_v8 }
 0x1f0   :  { %v376_v14 = vadd.f32 %v794_v58, %v375_v13  ;;  %v426_v15 = vmax.f32 %v384_v11, 0.0 }
 0x1f1   :  { %v951_v16 = vpop.f32.mrf.mxu1 }
 0x1f2   :  { %v424_v18 = vmax.f32 %v376_v14, 0.0  ;;  %v438_v22 = vpack.c.bf16 %v426_v15, %v425_v19  ;;  %v397_v26 = vadd.f32 %v951_v16, %v794_v58 }
 0x1f3   :  { %v388_v20 = vpop.f32.mrf.mxu1 }
 0x1f4   :  { %v437_v21 = vpack.c.bf16 %v424_v18, %v423_v17  ;;  %v389_v24 = vadd.f32 %v794_v58, %v388_v20  ;;  %v429_v33 = vmax.f32 %v397_v26, 0.0  ;;  %v1212_v17 = vld [vmem:[%s1281_s3 + $0x1] ss:$0 sm:$0xff] }
 0x1f5   :  { %v952_v23 = vpop.f32.mrf.mxu1 }
 0x1f6   :  { %v400_v25 = vadd.f32 %v952_v23, %v794_v58  ;;  %977 = vmatprep.mubr.bf16.mxu0 %v437_v21  ;;  %v427_v31 = vmax.f32 %v389_v24, 0.0 }
 0x1f7   :  { %v391_v27 = vpop.f32.mrf.mxu1  ;;  %978 = vmatmul.mubr.bf16.gmra.mxu0 %v438_v22 }
 0x1f8   :  { %v392_v28 = vadd.f32 %v794_v58, %v391_v27  ;;  %v430_v29 = vmax.f32 %v400_v25, 0.0 }
 0x1f9   :  { %v955_v30 = vpop.f32.mrf.mxu1 }
 0x1fa   :  { %v428_v32 = vmax.f32 %v392_v28, 0.0  ;;  %v440_v36 = vpack.c.bf16 %v430_v29, %v429_v33  ;;  %v413_v40 = vadd.f32 %v955_v30, %v794_v58 }
 0x1fb   :  { %v404_v34 = vpop.f32.mrf.mxu1 }
 0x1fc   :  { %v439_v35 = vpack.c.bf16 %v428_v32, %v427_v31  ;;  %v405_v38 = vadd.f32 %v794_v58, %v404_v34  ;;  %v433_v53 = vmax.f32 %v413_v40, 0.0 }
 0x1fd   :  { %v956_v37 = vpop.f32.mrf.mxu1 }
 0x1fe   :  { %v416_v39 = vadd.f32 %v956_v37, %v794_v58  ;;  %981 = vmatprep.mubr.bf16.mxu0 %v439_v35  ;;  %v431_v44 = vmax.f32 %v405_v38, 0.0 }
 0x1ff   :  { %v407_v41 = vpop.f32.mrf.mxu1  ;;  %982 = vmatmul.mubr.bf16.gmra.mxu0 %v440_v36 }
 0x200   :  { %v408_v42 = vadd.f32 %v794_v58, %v407_v41  ;;  %v434_v43 = vmax.f32 %v416_v39, 0.0 }
 0x202   :  { %v432_v45 = vmax.f32 %v408_v42, 0.0  ;;  %v442_v55 = vpack.c.bf16 %v434_v43, %v433_v53 }
 0x204   :  { %v441_v54 = vpack.c.bf16 %v432_v45, %v431_v44 }
 0x206   :  { %985 = vmatprep.mubr.bf16.mxu0 %v441_v54 }
 0x207   :  { %986 = vmatmul.mubr.bf16.gmra.mxu0 %v442_v55 }
 0x2af   :  { %v975_v56 = vpop.f32.mrf.mxu0 }
 0x2b1   :  { %v542_v57 = vpop.f32.mrf.mxu0 }
 0x2b3   :  { %v976_v59 = vpop.f32.mrf.mxu0 }
 0x2b4   :  { %v606_v14 = vpack.c.bf16 %v976_v59, %v975_v56 }
 0x2b5   :  { %v545_v60 = vpop.f32.mrf.mxu0 }
 0x2b6   :  { %v605_v15 = vpack.c.bf16 %v545_v60, %v542_v57 }
 0x2b7   :  { %v979_v61 = vpop.f32.mrf.mxu0 }
 0x2b9   :  { %v558_v62 = vpop.f32.mrf.mxu0 }
 0x2bb   :  { %v980_v63 = vpop.f32.mrf.mxu0 }
 0x2bc   :  { %v608_v12 = vpack.c.bf16 %v980_v63, %v979_v61 }
 0x2bd   :  { %v561_v0 = vpop.f32.mrf.mxu0 }
 0x2be   :  { %v607_v13 = vpack.c.bf16 %v561_v0, %v558_v62 }
 0x2bf   :  { %v983_v1 = vpop.f32.mrf.mxu0 }
 0x2c1   :  { %v574_v2 = vpop.f32.mrf.mxu0 }
 0x2c3   :  { %v984_v3 = vpop.f32.mrf.mxu0 }
 0x2c4   :  { %v610_v10 = vpack.c.bf16 %v984_v3, %v983_v1 }
 0x2c5   :  { %v577_v58 = vpop.f32.mrf.mxu0 }
 0x2c6   :  { %v609_v11 = vpack.c.bf16 %v577_v58, %v574_v2 }
 0x2c7   :  { %v987_v4 = vpop.f32.mrf.mxu0 }
 0x2c9   :  { %v590_v5 = vpop.f32.mrf.mxu0 }
 0x2cb   :  { %v988_v6 = vpop.f32.mrf.mxu0 }
 0x2cc   :  { %v612_v7 = vpack.c.bf16 %v988_v6, %v987_v4 }
 0x2cd   :  { %v593_v8 = vpop.f32.mrf.mxu0 }
 0x2ce   :  { %v611_v9 = vpack.c.bf16 %v593_v8, %v590_v5  ;;  %989 = vmatprep.subr.bf16.mxu1 %v612_v7 }
 0x2cf   :  { %990 = vmatpush3.bf16.msra.mxu1 %v612_v7 }
 0x2d0   :  { %991 = vmatprep.subr.bf16.mxu1 %v611_v9 }
 0x2d3   :  { %992 = vmatpush3.bf16.msra.mxu1 %v611_v9 }
 0x2d4   :  { %993 = vmatprep.subr.bf16.mxu1 %v610_v10 }
 0x2d7   :  { %994 = vmatpush3.bf16.msra.mxu1 %v610_v10 }
 0x2d8   :  { %995 = vmatprep.subr.bf16.mxu1 %v609_v11 }
 0x2db   :  { %996 = vmatpush3.bf16.msra.mxu1 %v609_v11 }
 0x2dc   :  { %997 = vmatprep.subr.bf16.mxu1 %v608_v12 }
 0x2df   :  { %998 = vmatpush3.bf16.msra.mxu1 %v608_v12 }
 0x2e0   :  { %999 = vmatprep.subr.bf16.mxu1 %v607_v13 }
 0x2e3   :  { %1000 = vmatpush3.bf16.msra.mxu1 %v607_v13 }
 0x2e4   :  { %1001 = vmatprep.subr.bf16.mxu1 %v606_v14 }
 0x2e7   :  { %1002 = vmatpush3.bf16.msra.mxu1 %v606_v14 }
 0x2e8   :  { %1003 = vmatprep.subr.bf16.mxu1 %v605_v15 }
 0x2eb   :  { %1004 = vmatpush3.bf16.msra.mxu1 %v605_v15 }
 0x2ee   :  { %1006 = vmatmul.mubr.bf16.vlgmr.msra.gmra.mxu1 %v1150_v46 }
 0x2ef   :  { %1009 = vmatprep.mubr.bf16.mxu1 %v1155_v47 }
 0x2f6   :  { %1010 = vmatmul.mubr.bf16.gmra.mxu1 %v1162_v48 }
 0x2f7   :  { %1013 = vmatprep.mubr.bf16.mxu1 %v1167_v49 }
 0x2fe   :  { %1014 = vmatmul.mubr.bf16.gmra.mxu1 %v1174_v50 }
 0x2ff   :  { %1017 = vmatprep.mubr.bf16.mxu1 %v1179_v51 }
 0x306   :  { %1018 = vmatmul.mubr.bf16.gmra.mxu1 %v1186_v52 }
 0x3ae   :  { %v1007_v16 = vpop.f32.mrf.mxu1 }
 0x3af   :  { %v664_v46 = vadd.f32 %v1007_v16, %v1212_v17 }
 0x3b0   :  { %v655_v18 = vpop.f32.mrf.mxu1 }
 0x3b1   :  { %v656_v48 = vadd.f32 %v1212_v17, %v655_v18  ;;  %v720_v50 = vmax.f32 %v664_v46, 0.0 }
 0x3b2   :  { %v1008_v47 = vpop.f32.mrf.mxu1 }
 0x3b3   :  { %v667_v49 = vadd.f32 %v1008_v47, %v1212_v17  ;;  %v718_v21 = vmax.f32 %v656_v48, 0.0 }
 0x3b4   :  { %v658_v19 = vpop.f32.mrf.mxu1 }
 0x3b5   :  { %v721_v20 = vmax.f32 %v667_v49, 0.0  ;;  %v659_v51 = vadd.f32 %v1212_v17, %v658_v19 }
 0x3b6   :  { %v1011_v52 = vpop.f32.mrf.mxu1 }
 0x3b7   :  { %v735_v22 = vpack.c.bf16 %v721_v20, %v720_v50  ;;  %v719_v23 = vmax.f32 %v659_v51, 0.0  ;;  %v680_v28 = vadd.f32 %v1011_v52, %v1212_v17 }
 0x3b8   :  { %v671_v24 = vpop.f32.mrf.mxu1 }
 0x3b9   :  { %v744_v25 = vunpack.c.l.bf16 %v735_v22  ;;  %v745_v26 = vunpack.c.h.bf16 %v735_v22  ;;  %v734_v27 = vpack.c.bf16 %v719_v23, %v718_v21  ;;  %v672_v32 = vadd.f32 %v1212_v17, %v671_v24 }
 0x3ba   :  { %v1012_v29 = vpop.f32.mrf.mxu1  ;;  %v724_v35 = vmax.f32 %v680_v28, 0.0 }
 0x3bb   :  { %760 = vst [vmem:[%s1282_s4 + $0x10] sm:$0xff] %v744_v25  ;;  %761 = vst [vmem:[%s1282_s4 + $0x18] sm:$0xff] %v745_v26  ;;  %v742_v30 = vunpack.c.l.bf16 %v734_v27  ;;  %v743_v31 = vunpack.c.h.bf16 %v734_v27  ;;  %v683_v33 = vadd.f32 %v1012_v29, %v1212_v17  ;;  %v722_v39 = vmax.f32 %v672_v32, 0.0 }
 0x3bc   :  { %v674_v34 = vpop.f32.mrf.mxu1 }
 0x3bd   :  { %758 = vst [vmem:[%s1282_s4] sm:$0xff] %v742_v30  ;;  %759 = vst [vmem:[%s1282_s4 + $0x8] sm:$0xff] %v743_v31  ;;  %v725_v36 = vmax.f32 %v683_v33, 0.0  ;;  %v675_v37 = vadd.f32 %v1212_v17, %v674_v34 }
 0x3be   :  { %v1015_v38 = vpop.f32.mrf.mxu1 }
 0x3bf   :  { %v737_v40 = vpack.c.bf16 %v725_v36, %v724_v35  ;;  %v723_v41 = vmax.f32 %v675_v37, 0.0  ;;  %v696_v53 = vadd.f32 %v1015_v38, %v1212_v17 }
 0x3c0   :  { %v687_v42 = vpop.f32.mrf.mxu1 }
 0x3c1   :  { %v748_v43 = vunpack.c.l.bf16 %v737_v40  ;;  %v749_v44 = vunpack.c.h.bf16 %v737_v40  ;;  %v736_v45 = vpack.c.bf16 %v723_v41, %v722_v39  ;;  %v688_v57 = vadd.f32 %v1212_v17, %v687_v42 }
 0x3c2   :  { %v1016_v54 = vpop.f32.mrf.mxu1  ;;  %v728_v61 = vmax.f32 %v696_v53, 0.0 }
 0x3c3   :  { %764 = vst [vmem:[%s1282_s4 + $0x30] sm:$0xff] %v748_v43  ;;  %765 = vst [vmem:[%s1282_s4 + $0x38] sm:$0xff] %v749_v44  ;;  %v746_v55 = vunpack.c.l.bf16 %v736_v45  ;;  %v747_v56 = vunpack.c.h.bf16 %v736_v45  ;;  %v699_v59 = vadd.f32 %v1016_v54, %v1212_v17  ;;  %v726_v1 = vmax.f32 %v688_v57, 0.0 }
 0x3c4   :  { %v690_v60 = vpop.f32.mrf.mxu1 }
 0x3c5   :  { %762 = vst [vmem:[%s1282_s4 + $0x20] sm:$0xff] %v746_v55  ;;  %763 = vst [vmem:[%s1282_s4 + $0x28] sm:$0xff] %v747_v56  ;;  %v729_v62 = vmax.f32 %v699_v59, 0.0  ;;  %v691_v63 = vadd.f32 %v1212_v17, %v690_v60 }
 0x3c6   :  { %v1019_v0 = vpop.f32.mrf.mxu1 }
 0x3c7   :  { %v739_v2 = vpack.c.bf16 %v729_v62, %v728_v61  ;;  %v727_v3 = vmax.f32 %v691_v63, 0.0  ;;  %v712_v7 = vadd.f32 %v1019_v0, %v1212_v17 }
 0x3c8   :  { %v703_v58 = vpop.f32.mrf.mxu1 }
 0x3c9   :  { %v752_v4 = vunpack.c.l.bf16 %v739_v2  ;;  %v753_v5 = vunpack.c.h.bf16 %v739_v2  ;;  %v738_v6 = vpack.c.bf16 %v727_v3, %v726_v1  ;;  %v704_v11 = vadd.f32 %v1212_v17, %v703_v58 }
 0x3ca   :  { %v1020_v8 = vpop.f32.mrf.mxu1  ;;  %v732_v14 = vmax.f32 %v712_v7, 0.0 }
 0x3cb   :  { %768 = vst [vmem:[%s1282_s4 + $0x50] sm:$0xff] %v752_v4  ;;  %769 = vst [vmem:[%s1282_s4 + $0x58] sm:$0xff] %v753_v5  ;;  %v750_v9 = vunpack.c.l.bf16 %v738_v6  ;;  %v751_v10 = vunpack.c.h.bf16 %v738_v6  ;;  %v715_v12 = vadd.f32 %v1020_v8, %v1212_v17  ;;  %v730_v18 = vmax.f32 %v704_v11, 0.0 }
 0x3cc   :  { %v706_v13 = vpop.f32.mrf.mxu1 }
 0x3cd   :  { %766 = vst [vmem:[%s1282_s4 + $0x40] sm:$0xff] %v750_v9  ;;  %767 = vst [vmem:[%s1282_s4 + $0x48] sm:$0xff] %v751_v10  ;;  %v733_v15 = vmax.f32 %v715_v12, 0.0  ;;  %v707_v16 = vadd.f32 %v1212_v17, %v706_v13 }
 0x3cf   :  { %v741_v46 = vpack.c.bf16 %v733_v15, %v732_v14  ;;  %v731_v47 = vmax.f32 %v707_v16, 0.0 }
 0x3d1   :  { %v756_v48 = vunpack.c.l.bf16 %v741_v46  ;;  %v757_v49 = vunpack.c.h.bf16 %v741_v46  ;;  %v740_v19 = vpack.c.bf16 %v731_v47, %v730_v18 }
 0x3d3   :  { %772 = vst [vmem:[%s1282_s4 + $0x70] sm:$0xff] %v756_v48  ;;  %773 = vst [vmem:[%s1282_s4 + $0x78] sm:$0xff] %v757_v49  ;;  %v754_v50 = vunpack.c.l.bf16 %v740_v19  ;;  %v755_v20 = vunpack.c.h.bf16 %v740_v19 }
 0x3d5   :  { %770 = vst [vmem:[%s1282_s4 + $0x60] sm:$0xff] %v754_v50  ;;  %771 = vst [vmem:[%s1282_s4 + $0x68] sm:$0xff] %v755_v20 }

</bundles_post_ra>
